<compile_context>
chip_gen: v7x
topology: tpu7x:2x2x1
jax: 0.10.0
libtpu: 0.0.40
codegen_flags: <defaults>
</compile_context>

<pallas_src>
import math
import functools

import jax
import jax.numpy as jnp
from jax import lax
from jax.experimental import pallas as pl
from jax.experimental.pallas import tpu as pltpu


# ---------------------------------------------------------------------------
# Kernels
# ---------------------------------------------------------------------------

def _linear_bias_kernel(x_ref, w_ref, b_ref, o_ref, acc_ref):
    # x_ref: (tm, tk)   w_ref: (tn, tk)   b_ref: (1, tn)
    # o_ref: (tm, tn)   acc_ref: (tm, tn) f32
    k = pl.program_id(2)

    @pl.when(k == 0)
    def _():
        acc_ref[...] = jnp.zeros_like(acc_ref)

    # x @ w.T on the MXU, contracting the K axis of both operands directly
    # (weight stays in its native (out_features, in_features) layout).
    acc_ref[...] += lax.dot_general(
        x_ref[...], w_ref[...],
        dimension_numbers=(((1,), (1,)), ((), ())),
        preferred_element_type=jnp.float32)

    @pl.when(k == pl.num_programs(2) - 1)
    def _():
        o_ref[...] = (acc_ref[...] + b_ref[...]).astype(o_ref.dtype)


def _linear_nobias_kernel(x_ref, w_ref, o_ref, acc_ref):
    k = pl.program_id(2)

    @pl.when(k == 0)
    def _():
        acc_ref[...] = jnp.zeros_like(acc_ref)

    acc_ref[...] += lax.dot_general(
        x_ref[...], w_ref[...],
        dimension_numbers=(((1,), (1,)), ((), ())),
        preferred_element_type=jnp.float32)

    @pl.when(k == pl.num_programs(2) - 1)
    def _():
        o_ref[...] = acc_ref[...].astype(o_ref.dtype)


# ---------------------------------------------------------------------------
# Wrapper
# ---------------------------------------------------------------------------

def _round_up(x, m):
    return ((x + m - 1) // m) * m


@functools.partial(jax.jit, static_argnames=("tm", "tn", "tk"))
def _column_parallel_linear_2d(x2d, weight, bias, *, tm, tn, tk):
    """x2d: (M, K); weight: (N, K); bias: (N,) or None -> (M, N)."""
    M, K = x2d.shape
    N = weight.shape[0]

    # Pad to tile multiples (K padded with zeros -> exact contraction;
    # padded M/N rows/cols are sliced off afterwards).
    M_pad = _round_up(M, tm)
    K_pad = _round_up(K, tk)
    N_pad = _round_up(N, tn)

    if (M_pad, K_pad) != (M, K):
        x2d = jnp.pad(x2d, ((0, M_pad - M), (0, K_pad - K)))
    if (N_pad, K_pad) != (N, K):
        weight = jnp.pad(weight, ((0, N_pad - N), (0, K_pad - K)))

    grid = (M_pad // tm, N_pad // tn, K_pad // tk)

    x_spec = pl.BlockSpec((tm, tk), lambda i, j, k: (i, k))
    w_spec = pl.BlockSpec((tn, tk), lambda i, j, k: (j, k))
    o_spec = pl.BlockSpec((tm, tn), lambda i, j, k: (i, j))

    cost = pl.CostEstimate(
        flops=2 * M_pad * N_pad * K_pad,
        transcendentals=0,
        bytes_accessed=(x2d.size * x2d.dtype.itemsize
                        + weight.size * weight.dtype.itemsize
                        + M_pad * N_pad * x2d.dtype.itemsize
                        + (N_pad * 4 if bias is not None else 0)),
    )
    cparams = pltpu.CompilerParams(
        dimension_semantics=("parallel", "parallel", "arbitrary"))

    if bias is None:
        out_pad = pl.pallas_call(
            _linear_nobias_kernel,
            out_shape=jax.ShapeDtypeStruct((M_pad, N_pad), x2d.dtype),
            grid_spec=pltpu.PrefetchScalarGridSpec(
                num_scalar_prefetch=0,
                grid=grid,
                in_specs=[x_spec, w_spec],
                out_specs=o_spec,
                scratch_shapes=[pltpu.VMEM((tm, tn), jnp.float32)],
            ),
            compiler_params=cparams,
            cost_estimate=cost,
        )(x2d, weight)
    else:
        b2d = bias.astype(jnp.float32).reshape(1, N)
        if N_pad != N:
            b2d = jnp.pad(b2d, ((0, 0), (0, N_pad - N)))
        b_spec = pl.BlockSpec((1, tn), lambda i, j, k: (0, j))
        out_pad = pl.pallas_call(
            _linear_bias_kernel,
            out_shape=jax.ShapeDtypeStruct((M_pad, N_pad), x2d.dtype),
            grid_spec=pltpu.PrefetchScalarGridSpec(
                num_scalar_prefetch=0,
                grid=grid,
                in_specs=[x_spec, w_spec, b_spec],
                out_specs=o_spec,
                scratch_shapes=[pltpu.VMEM((tm, tn), jnp.float32)],
            ),
            compiler_params=cparams,
            cost_estimate=cost,
        )(x2d, weight, b2d)

    return out_pad[:M, :N]


def column_parallel_linear(x, weight, bias=None, *, tm=None, tn=None, tk=None):
    """x: (..., in_features); weight: (out, in); bias: (out,) or None.

    Computes x @ weight.T + bias with a tiled, pipelined Pallas matmul.
    """
    *lead, in_features = x.shape
    out_features = weight.shape[0]
    M = 1
    for d in lead:
        M *= d

    # Tile sizes: 256-aligned M/N tiles and a 512-deep K tile by default
    # (fits comfortably in the default scoped VMEM on v5e/v6e/v7x with
    # double-buffering), clamped down for small problem sizes so blocks stay
    # (8,128)-legal without gross over-padding.
    if tm is None:
        tm = min(256, _round_up(M, 8))
    if tn is None:
        tn = min(256, _round_up(out_features, 128))   # lane-dense output tile
    if tk is None:
        tk = min(512, _round_up(in_features, 128))

    x2d = x.reshape(M, in_features)
    out2d = _column_parallel_linear_2d(x2d, weight, bias, tm=tm, tn=tn, tk=tk)
    return out2d.reshape(*lead, out_features)


# ---------------------------------------------------------------------------
# Parameter init (matches nn.init.kaiming_uniform_(a=sqrt(5)) + bias bound)
# ---------------------------------------------------------------------------

def init_params(key, in_features, out_features, use_bias=True):
    kw, kb = jax.random.split(key)
    fan_in = in_features
    w_bound = 1.0 / math.sqrt(fan_in)
    weight = jax.random.uniform(
        kw, (out_features, in_features), jnp.float32, -w_bound, w_bound)
    bias = None
    if use_bias:
        b_bound = 1.0 / math.sqrt(fan_in)
        bias = jax.random.uniform(
            kb, (out_features,), jnp.float32, -b_bound, b_bound)
    return weight, bias


# ---------------------------------------------------------------------------
# Test
# ---------------------------------------------------------------------------

if __name__ == "__main__":
    key = jax.random.PRNGKey(0)
    k_x, k_p = jax.random.split(key)

    batch, seq, in_features, out_features = 2, 8, 32, 64
    x = jax.random.normal(k_x, (batch, seq, in_features), jnp.float32)
    weight, bias = init_params(k_p, in_features, out_features, use_bias=True)

    # With bias.
    out = column_parallel_linear(x, weight, bias)
    out = jax.block_until_ready(out)
    ref = x @ weight.T + bias
    assert out.shape == (batch, seq, out_features)
    assert jnp.allclose(out, ref, atol=1e-5, rtol=1e-5)

    # Without bias (separate kernel variant, no dummy-bias DMA).
    out_nb = column_parallel_linear(x, weight, None)
    out_nb = jax.block_until_ready(out_nb)
    ref_nb = x @ weight.T
    assert jnp.allclose(out_nb, ref_nb, atol=1e-5, rtol=1e-5)

    # A larger, non-tile-aligned shape to exercise the tiled/padded path.
    k_x2, k_p2 = jax.random.split(k_x)
    x_big = jax.random.normal(k_x2, (4, 300, 384), jnp.float32)
    w_big, b_big = init_params(k_p2, 384, 640, use_bias=True)
    out_big = column_parallel_linear(x_big, w_big, b_big)
    out_big = jax.block_until_ready(out_big)
    ref_big = x_big @ w_big.T + b_big
    assert out_big.shape == (4, 300, 640)
    assert jnp.allclose(out_big, ref_big, atol=1e-4, rtol=1e-4)

    print("KERNEL_OK")
</pallas_src>

<mosaic_0001>
module attributes {stable_mosaic.version = 11 : i64} {
  func.func @_linear_bias_kernel(%arg0: i32, %arg1: i32, %arg2: i32, %arg3: memref<16x128xf32, #tpu.memory_space<vmem>>, %arg4: memref<128x128xf32, #tpu.memory_space<vmem>>, %arg5: memref<1x128xf32, #tpu.memory_space<vmem>>, %arg6: memref<16x128xf32, #tpu.memory_space<vmem>>, %arg7: memref<16x128xf32, #tpu.memory_space<vmem>>) attributes {dimension_semantics = [#tpu.dimension_semantics<parallel>, #tpu.dimension_semantics<parallel>, #tpu.dimension_semantics<arbitrary>], iteration_bounds = array<i64: 1, 1, 1>, scalar_prefetch = 0 : i64, scratch_operands = 1 : i64, tpu.core_type = #tpu.core_type<tc>, window_params = [{transform_indices = @transform_0, window_bounds = array<i64: 16, 128>}, {transform_indices = @transform_1, window_bounds = array<i64: 128, 128>}, {transform_indices = @transform_2, window_bounds = array<i64: 1, 128>}, {transform_indices = @transform_3, window_bounds = array<i64: 16, 128>}]} {
    %c0_i32 = arith.constant 0 : i32
    %0 = arith.cmpi eq, %arg2, %c0_i32 : i32
    %1 = arith.extui %0 : i1 to i32
    %c0_i32_0 = arith.constant 0 : i32
    %2 = arith.cmpi ne, %1, %c0_i32_0 : i32
    scf.if %2 {
      %cst_10 = arith.constant 0.000000e+00 : f32
      %12 = vector.broadcast %cst_10 : f32 to vector<16x128xf32>
      %c0_11 = arith.constant 0 : index
      %c0_12 = arith.constant 0 : index
      %13 = vector.load %arg7[%c0_11, %c0_12] : memref<16x128xf32, #tpu.memory_space<vmem>>, vector<16x128xf32>
      tpu.vector_store %arg7[%c0_11, %c0_12], %12 {strides = array<i32>} : memref<16x128xf32, #tpu.memory_space<vmem>>, vector<16x128xf32>,
    } else {
    }
    %c0 = arith.constant 0 : index
    %c0_1 = arith.constant 0 : index
    %3 = vector.load %arg7[%c0, %c0_1] : memref<16x128xf32, #tpu.memory_space<vmem>>, vector<16x128xf32>
    %c0_2 = arith.constant 0 : index
    %c0_3 = arith.constant 0 : index
    %4 = vector.load %arg3[%c0_2, %c0_3] : memref<16x128xf32, #tpu.memory_space<vmem>>, vector<16x128xf32>
    %c0_4 = arith.constant 0 : index
    %c0_5 = arith.constant 0 : index
    %5 = vector.load %arg4[%c0_4, %c0_5] : memref<128x128xf32, #tpu.memory_space<vmem>>, vector<128x128xf32>
    %cst = arith.constant dense<0.000000e+00> : vector<16x128xf32>
    %6 = tpu.matmul %4, %5, %cst {dimension_numbers = #tpu.dot_dimension_numbers<[1], [1], [0], [0], [0, 0, 1, 0], [], []>} : vector<16x128xf32>, vector<128x128xf32>, vector<16x128xf32> -> vector<16x128xf32>
    %7 = arith.addf %3, %6 : vector<16x128xf32>
    %c0_6 = arith.constant 0 : index
    %c0_7 = arith.constant 0 : index
    %8 = vector.load %arg7[%c0_6, %c0_7] : memref<16x128xf32, #tpu.memory_space<vmem>>, vector<16x128xf32>
    tpu.vector_store %arg7[%c0_6, %c0_7], %7 {strides = array<i32>} : memref<16x128xf32, #tpu.memory_space<vmem>>, vector<16x128xf32>,
    %c0_i32_8 = arith.constant 0 : i32
    %9 = arith.cmpi eq, %arg2, %c0_i32_8 : i32
    %10 = arith.extui %9 : i1 to i32
    %c0_i32_9 = arith.constant 0 : i32
    %11 = arith.cmpi ne, %10, %c0_i32_9 : i32
    scf.if %11 {
      %c0_10 = arith.constant 0 : index
      %c0_11 = arith.constant 0 : index
      %12 = vector.load %arg7[%c0_10, %c0_11] : memref<16x128xf32, #tpu.memory_space<vmem>>, vector<16x128xf32>
      %c0_12 = arith.constant 0 : index
      %c0_13 = arith.constant 0 : index
      %13 = vector.load %arg5[%c0_12, %c0_13] : memref<1x128xf32, #tpu.memory_space<vmem>>, vector<1x128xf32>
      %14 = vector.broadcast %13 : vector<1x128xf32> to vector<16x128xf32>
      %15 = arith.addf %12, %14 : vector<16x128xf32>
      %c0_14 = arith.constant 0 : index
      %c0_15 = arith.constant 0 : index
      %16 = vector.load %arg6[%c0_14, %c0_15] : memref<16x128xf32, #tpu.memory_space<vmem>>, vector<16x128xf32>
      tpu.vector_store %arg6[%c0_14, %c0_15], %15 {strides = array<i32>} : memref<16x128xf32, #tpu.memory_space<vmem>>, vector<16x128xf32>,
    } else {
    }
    return
  }
  func.func @transform_0(%arg0: i32, %arg1: i32, %arg2: i32) -> (i32, i32) {
    %c0_i32 = arith.constant 0 : i32
    return %arg0, %arg2 : i32, i32
  }
  func.func @transform_1(%arg0: i32, %arg1: i32, %arg2: i32) -> (i32, i32) {
    %c0_i32 = arith.constant 0 : i32
    return %arg1, %arg2 : i32, i32
  }
  func.func @transform_2(%arg0: i32, %arg1: i32, %arg2: i32) -> (i32, i32) {
    %c0_i32 = arith.constant 0 : i32
    %c0_i32_0 = arith.constant 0 : i32
    return %c0_i32, %arg1 : i32, i32
  }
  func.func @transform_3(%arg0: i32, %arg1: i32, %arg2: i32) -> (i32, i32) {
    %c0_i32 = arith.constant 0 : i32
    return %arg0, %arg1 : i32, i32
  }
}

</mosaic_0001>

<bundles_post_ra>
// kernel: _column_parallel_linear_2d.1
= control target key start
LH: loop header
LB: loop body
LE: loop exit
PB: predicated region body
PF: predicated region fallthrough
CT: control target
= control target key end

     0   :  { %s357_s0 = inlined_call_operand.vmem [shape: f32[16,128], index: 0, kind: input, shape index: {}]   ;;  %s358_s1 = inlined_call_operand.vmem [shape: f32[128,128], index: 1, kind: input, shape index: {}]   ;;  %s359_s2 = inlined_call_operand.vmem [shape: f32[1,128], index: 2, kind: input, shape index: {}]   ;;  %s360_s3 = inlined_call_operand.hbm [shape: f32[16,128], index: 3, kind: output, shape index: {}]  }
   0x1   :  { %v25_v0 = vld [vmem:[%s358_s1] sm:$0xff]  ;;  %v26_v1 = vld [vmem:[%s358_s1 + $0x8] sm:$0xff]  ;;  %v27_v2 = vld [vmem:[%s358_s1 + $0x10] sm:$0xff] }
   0x2   :  { %v206_v3 = vpack.c.bf16 %v26_v1, %v25_v0  ;;  %v28_v4 = vld [vmem:[%s358_s1 + $0x18] sm:$0xff]  ;;  %v23_v6 = vld [vmem:[%s357_s0] sm:$0xff]  ;;  %v30_v8 = vld [vmem:[%s358_s1 + $0x28] sm:$0xff] }
   0x3   :  { %v210_v5 = vpack.c.bf16 %v28_v4, %v27_v2  ;;  %v29_v7 = vld [vmem:[%s358_s1 + $0x20] sm:$0xff]  ;;  %203 = vmatprep.mubr.f32.mxu0 %v23_v6 }
   0x4   :  { %207 = vmatprep.subr.bf16.mxu0 %v206_v3 }
   0x5   :  { %209 = vmatpush3.bf16.xpose.msra.mxu0 %v206_v3 }
   0x6   :  { %211 = vmatprep.subr.bf16.mxu0 %v210_v5 }
   0x7   :  { %8 = vsyncpa [#allocation4], 0  ;;  %v214_v9 = vpack.c.bf16 %v30_v8, %v29_v7  ;;  %v31_v10 = vld [vmem:[%s358_s1 + $0x30] sm:$0xff]  ;;  %v32_v11 = vld [vmem:[%s358_s1 + $0x38] sm:$0xff]  ;;  %s265_s23 = smov [#allocation3]  }
   0x8   :  { %v218_v12 = vpack.c.bf16 %v32_v11, %v31_v10  ;;  %v33_v13 = vld [vmem:[%s358_s1 + $0x40] sm:$0xff]  ;;  %v34_v14 = vld [vmem:[%s358_s1 + $0x48] sm:$0xff]  ;;  %v35_v16 = vld [vmem:[%s358_s1 + $0x50] sm:$0xff]  ;;  %s141_s24 = sshll.u32 %s265_s23, 4  ;;  %s142_s24 = int_to_ptr.vmem [resolvable:$true] %s141_s24 }
   0x9   :  { %v222_v15 = vpack.c.bf16 %v34_v14, %v33_v13  ;;  %v36_v17 = vld [vmem:[%s358_s1 + $0x58] sm:$0xff]  ;;  %v37_v19 = vld [vmem:[%s358_s1 + $0x60] sm:$0xff]  ;;  %v38_v20 = vld [vmem:[%s358_s1 + $0x68] sm:$0xff]  ;;  %p246_p1 = scmp.lt.s32.totalorder %s142_s24, %s142_s24 }
   0xa   :  { %v226_v18 = vpack.c.bf16 %v36_v17, %v35_v16  ;;  %v230_v21 = vpack.c.bf16 %v38_v20, %v37_v19  ;;  %v39_v22 = vld [vmem:[%s358_s1 + $0x70] sm:$0xff]  ;;  %v40_v23 = vld [vmem:[%s358_s1 + $0x78] sm:$0xff]  ;;  %v24_v25 = vld [vmem:[%s357_s0 + $0x8] sm:$0xff]  ;;  %s241_s1 = scalar_lea.vmem %s142_s24, 256 }
   0xb   :  { %v234_v24 = vpack.c.bf16 %v40_v23, %v39_v22  ;;  %v152_v26 = vld [vmem:[%s359_s2] ss:$0 sm:$0xff]  ;;  %p242_p0 = scmp.ne.s32.totalorder %s142_s24, %s241_s1  ;;  %p247_p2 = scmp.lt.s32.totalorder %s241_s1, %s241_s1 }
   0xd   :  { %213 = vmatpush3.bf16.xpose.msra.mxu0 %v210_v5  ;;  %p248_p3 = por %p247_p2, %p246_p1 }
   0xe   :  { %215 = vmatprep.subr.bf16.mxu0 %v214_v9 }
   0xf   :  { %p249_p4 = pnand %p248_p3, %p242_p0 }
  0x15   :  { %217 = vmatpush3.bf16.xpose.msra.mxu0 %v214_v9 }
  0x16   :  { %219 = vmatprep.subr.bf16.mxu0 %v218_v12 }
  0x1d   :  { %221 = vmatpush3.bf16.xpose.msra.mxu0 %v218_v12 }
  0x1e   :  { %223 = vmatprep.subr.bf16.mxu0 %v222_v15 }
  0x25   :  { %225 = vmatpush3.bf16.xpose.msra.mxu0 %v222_v15 }
  0x26   :  { %227 = vmatprep.subr.bf16.mxu0 %v226_v18 }
  0x2d   :  { %229 = vmatpush3.bf16.xpose.msra.mxu0 %v226_v18 }
  0x2e   :  { %231 = vmatprep.subr.bf16.mxu0 %v230_v21 }
  0x35   :  { %233 = vmatpush3.bf16.xpose.msra.mxu0 %v230_v21 }
  0x36   :  { %235 = vmatprep.subr.bf16.mxu0 %v234_v24 }
  0x3d   :  { %237 = vmatpush3.bf16.xpose.msra.mxu0 %v234_v24 }
  0x44   :  { %204 = vmatmul.mubr.f32.vlgmr.msra.gmra.mrb[0].mxu0 %v24_v25 }
 0x117   :  { %v205_v27 = vpop.f32.mrb[0].mxu0 }
 0x118   :  { %v133_v28 = vadd.f32 %v205_v27, %v152_v26  ;;  %v107_v29 = vpop.f32.mrb[1].mxu0 }
 0x119   :  { %v132_v30 = vadd.f32 %v152_v26, %v107_v29 }
 0x11a   :  { %135 = vst [vmem:[#allocation3 + $0x8] sm:$0xff] %v133_v28 }
 0x11b   :  { %134 = vst [vmem:[#allocation3] sm:$0xff] %v132_v30 }
 0x11c   :  { %252 = shalt.err (!%p249_p4)
}
 0x11d   :  { %s253_s2 = scalar_lea.hbm %s360_s3, 256 }
 0x11e   :  { %p254_p5 = scmp.ne.s32.totalorder %s360_s3, %s253_s2  ;;  %p257_p6 = scmp.lt.u32.totalorder %s253_s2, %s360_s3 }
 0x120   :  { %p259_p7 = pnand %p257_p6, %p254_p5 }
 0x122   :  { %262 = shalt.err (!%p259_p7)
}
 0x123   :  { %s266_s30 = smov 128   ;;  %s267_s4 = smov 8  }
 0x124   :  { %147 = dma.vmem_to_hbm [thread:$0]  %s142_s24, 256, %s360_s3, [#allocation4], %s266_s30, %s266_s30, %s267_s4  }
 0x125   :  { %263 = dma.done.wait [#allocation4], 256  }
 0x126   :  { %264 = vsyncadd [#allocation4], 4294967040 }
 0x127   :  { %151 = vsyncpa [#allocation4], 1 }

</bundles_post_ra>
